<compile_context>
chip_gen: v6e
topology: v6e:2x2x1
jax: 0.10.0
libtpu: 0.0.40
codegen_flags: <defaults>
</compile_context>

<pallas_src>
import functools

import jax
import jax.numpy as jnp
from jax.experimental import pallas as pl
from jax.experimental.pallas import tpu as pltpu

LOG_STD_BOUNDS = (-5.0, 2.0)
LANE = 128
SUBLANE_BF16 = 16


def _round_up(x, m):
    return (x + m - 1) // m * m


def _actor_kernel(x_ref, w1_ref, b1_ref, w2_ref, b2_ref, w3_ref, b3_ref,
                  out_ref, *, out_dim):
    """Fused trunk MLP + diag-Gaussian head for one batch tile.

    Matmuls run in bf16 on the MXU with f32 accumulation; elementwise math
    (bias add, ReLU, tanh, rescale, exp) runs in f32. mu and std are packed
    into one lane-dense output slab: lanes [0:out_dim] = mu,
    lanes [out_dim:2*out_dim] = std.
    """
    # Raw f32 tile, cast in-kernel (VPU) instead of materializing a padded
    # bf16 copy in the wrapper. The unaligned contraction dim (in_dim) is
    # zero-padded internally by the matmul lowering.
    x = x_ref[...].astype(jnp.bfloat16)

    # Layer 1: Linear + ReLU
    h1 = jnp.dot(x, w1_ref[...], preferred_element_type=jnp.float32) + b1_ref[...]
    h1 = jnp.maximum(h1, 0.0)

    # Layer 2: Linear + ReLU
    h2 = jnp.dot(h1.astype(jnp.bfloat16), w2_ref[...],
                 preferred_element_type=jnp.float32) + b2_ref[...]
    h2 = jnp.maximum(h2, 0.0)

    # Head: Linear producing packed [mu | log_std | zero-pad] in one 128-lane slab.
    a = jnp.dot(h2.astype(jnp.bfloat16), w3_ref[...],
                preferred_element_type=jnp.float32) + b3_ref[...]

    lo, hi = LOG_STD_BOUNDS
    log_std = jnp.tanh(a)                                   # EUP tanh, f32
    log_std = lo + 0.5 * (hi - lo) * (log_std + 1.0)
    std = jnp.exp(log_std)                                  # EUP exp, f32

    # Select mu on lanes [0:out_dim], std elsewhere (valid std lives on
    # lanes [out_dim:2*out_dim]; remaining lanes are sliced off in the wrapper).
    lane = jax.lax.broadcasted_iota(jnp.int32, a.shape, 1)
    packed = jnp.where(lane < out_dim, a, std)
    out_ref[...] = packed.astype(out_ref.dtype)


def prepare_params(raw, in_dim, out_dim, hidden_dim):
    """One-time weight prep: pad hidden/head dims to 128 lanes, cast to bf16.

    Raw weights are [fan_in, fan_out] (kernel computes x @ W + b, matching
    PyTorch's x @ W.T). The head weight/bias are repacked so mu occupies
    columns [0:out_dim] and log_std columns [out_dim:2*out_dim] of a single
    128-lane-wide head, so the kernel emits ONE lane-dense output slab.
    The input contraction dim (in_dim) is left unpadded: the raw state is fed
    directly to the kernel.
    """
    del in_dim  # kept for API symmetry; w1's fan_in stays unpadded
    hid_pad = _round_up(hidden_dim, LANE)
    head_pad = _round_up(2 * out_dim, LANE)

    w1 = jnp.pad(raw["w1"], ((0, 0), (0, hid_pad - hidden_dim))).astype(jnp.bfloat16)
    b1 = jnp.pad(raw["b1"], (0, hid_pad - hidden_dim)).reshape(1, hid_pad).astype(jnp.float32)
    w2 = jnp.pad(raw["w2"], ((0, hid_pad - hidden_dim),
                             (0, hid_pad - hidden_dim))).astype(jnp.bfloat16)
    b2 = jnp.pad(raw["b2"], (0, hid_pad - hidden_dim)).reshape(1, hid_pad).astype(jnp.float32)

    w3_mu, w3_ls = raw["w3"][:, :out_dim], raw["w3"][:, out_dim:]
    b3_mu, b3_ls = raw["b3"][:out_dim], raw["b3"][out_dim:]
    w3p = jnp.zeros((hid_pad, head_pad), jnp.float32)
    w3p = w3p.at[:hidden_dim, :out_dim].set(w3_mu)
    w3p = w3p.at[:hidden_dim, out_dim:2 * out_dim].set(w3_ls)
    b3p = jnp.zeros((1, head_pad), jnp.float32)
    b3p = b3p.at[0, :out_dim].set(b3_mu)
    b3p = b3p.at[0, out_dim:2 * out_dim].set(b3_ls)

    return dict(w1=w1, b1=b1, w2=w2, b2=b2,
                w3=w3p.astype(jnp.bfloat16), b3=b3p)


def diag_gaussian_actor_forward(state, prepared, out_dim, *, block_b=1024):
    """state: [B, in_dim] f32 (raw, unpadded). prepared: output of prepare_params.

    Returns (mu, std), each [B, out_dim] f32.
    """
    B, in_dim = state.shape
    hid_pad = prepared["w1"].shape[1]
    head_pad = prepared["w3"].shape[1]

    # Batch tile: multiple of 16 (bf16 packs two rows per sublane) and chosen so
    # the grid has >= 2 steps whenever B allows (keeps both v7x TCs busy),
    # capped at block_b to amortize per-step overhead on v5e/v6e. Ragged last
    # block handled by Pallas via the cdiv grid (no batch padding).
    bt = max(SUBLANE_BF16, min(block_b, _round_up(pl.cdiv(B, 2), SUBLANE_BF16)))
    grid = (pl.cdiv(B, bt),)

    def resident(shape):  # whole-array block, same block every grid step
        return pl.BlockSpec(shape, lambda i: (0, 0))

    w_bytes = sum(prepared[k].size * prepared[k].dtype.itemsize
                  for k in ("w1", "b1", "w2", "b2", "w3", "b3"))
    cost = pl.CostEstimate(
        flops=2 * B * (in_dim * hid_pad + hid_pad * hid_pad + hid_pad * head_pad),
        transcendentals=2 * B * head_pad,                      # tanh + exp
        bytes_accessed=B * in_dim * 4 + w_bytes + B * head_pad * 2,
    )

    packed = pl.pallas_call(
        functools.partial(_actor_kernel, out_dim=out_dim),
        out_shape=jax.ShapeDtypeStruct((B, head_pad), jnp.bfloat16),
        grid=grid,
        in_specs=[
            pl.BlockSpec((bt, in_dim), lambda i: (i, 0)),       # state tile (pipelined)
            resident(prepared["w1"].shape),
            resident(prepared["b1"].shape),
            resident(prepared["w2"].shape),
            resident(prepared["b2"].shape),
            resident(prepared["w3"].shape),
            resident(prepared["b3"].shape),
        ],
        out_specs=pl.BlockSpec((bt, head_pad), lambda i: (i, 0)),
        compiler_params=pltpu.CompilerParams(
            dimension_semantics=("parallel",),
            vmem_limit_bytes=32 * 1024 * 1024),
        cost_estimate=cost,
    )(state, prepared["w1"], prepared["b1"], prepared["w2"], prepared["b2"],
      prepared["w3"], prepared["b3"])

    mu = packed[:, :out_dim].astype(jnp.float32)
    std = packed[:, out_dim:2 * out_dim].astype(jnp.float32)
    return mu, std


def init_params(key, in_dim, out_dim, hidden_dim):
    """Synthetic init mimicking nn.Linear bounds; weights stored [fan_in, fan_out]."""
    ks = jax.random.split(key, 6)

    def linear(kw, kb, fan_in, fan_out):
        bound = 1.0 / jnp.sqrt(fan_in)
        w = jax.random.uniform(kw, (fan_in, fan_out), jnp.float32, -bound, bound)
        b = jax.random.uniform(kb, (fan_out,), jnp.float32, -bound, bound)
        return w, b

    w1, b1 = linear(ks[0], ks[1], in_dim, hidden_dim)
    w2, b2 = linear(ks[2], ks[3], hidden_dim, hidden_dim)
    w3, b3 = linear(ks[4], ks[5], hidden_dim, 2 * out_dim)
    return dict(w1=w1, b1=b1, w2=w2, b2=b2, w3=w3, b3=b3)


def reference_forward(state, raw, out_dim):
    """Pure-JAX reference with the SAME dtype policy (bf16 matmuls, f32 elsewhere)."""
    x = state.astype(jnp.bfloat16)
    h = jnp.maximum(jnp.dot(x, raw["w1"].astype(jnp.bfloat16),
                            preferred_element_type=jnp.float32) + raw["b1"], 0.0)
    h = jnp.maximum(jnp.dot(h.astype(jnp.bfloat16), raw["w2"].astype(jnp.bfloat16),
                            preferred_element_type=jnp.float32) + raw["b2"], 0.0)
    a = jnp.dot(h.astype(jnp.bfloat16), raw["w3"].astype(jnp.bfloat16),
                preferred_element_type=jnp.float32) + raw["b3"]
    mu, log_std = a[:, :out_dim], a[:, out_dim:]
    log_std = jnp.tanh(log_std)
    lo, hi = LOG_STD_BOUNDS
    log_std = lo + 0.5 * (hi - lo) * (log_std + 1.0)
    return mu, jnp.exp(log_std)


if __name__ == "__main__":
    key = jax.random.PRNGKey(0)
    k_state, k_params = jax.random.split(key)

    # Small shapes consistent with the module (hidden_dim=256 is the module default).
    # B / in_dim / out_dim are deliberately "awkward" to exercise the ragged-batch
    # and lane-padding paths.
    B, in_dim, out_dim, hidden_dim = 37, 19, 7, 256

    state = jax.random.normal(k_state, (B, in_dim), dtype=jnp.float32)
    raw_params = init_params(k_params, in_dim, out_dim, hidden_dim)
    prepared = prepare_params(raw_params, in_dim, out_dim, hidden_dim)

    mu, std = diag_gaussian_actor_forward(state, prepared, out_dim)
    mu = jax.block_until_ready(mu)
    std = jax.block_until_ready(std)

    mu_ref, std_ref = reference_forward(state, raw_params, out_dim)

    assert mu.shape == (B, out_dim) and std.shape == (B, out_dim)
    # Tolerance loosened vs the f32-output version: the kernel now stores bf16
    # (relative error ~2^-9) to halve output writeback traffic.
    assert jnp.allclose(mu, mu_ref, atol=5e-3, rtol=1e-2), "mu mismatch vs reference"
    assert jnp.allclose(std, std_ref, atol=5e-3, rtol=1e-2), "std mismatch vs reference"
    assert bool(jnp.all(std > 0.0)), "std must be positive"

    print("KERNEL_OK")
</pallas_src>

<mosaic_0001>
module attributes {stable_mosaic.version = 11 : i64} {
  func.func @_actor_kernel(%arg0: i32, %arg1: memref<32x19xf32, #tpu.memory_space<vmem>>, %arg2: memref<19x256xbf16, #tpu.memory_space<vmem>>, %arg3: memref<1x256xf32, #tpu.memory_space<vmem>>, %arg4: memref<256x256xbf16, #tpu.memory_space<vmem>>, %arg5: memref<1x256xf32, #tpu.memory_space<vmem>>, %arg6: memref<256x128xbf16, #tpu.memory_space<vmem>>, %arg7: memref<1x128xf32, #tpu.memory_space<vmem>>, %arg8: memref<32x128xbf16, #tpu.memory_space<vmem>>) attributes {dimension_semantics = [#tpu.dimension_semantics<parallel>], iteration_bounds = array<i64: 2>, scalar_prefetch = 0 : i64, scratch_operands = 0 : i64, tpu.core_type = #tpu.core_type<tc>, window_params = [{transform_indices = @transform_0, window_bounds = array<i64: 32, 19>}, {pipeline_mode = #tpu.pipeline_mode<synchronous>, transform_indices = @transform_1, window_bounds = array<i64: 19, 256>}, {pipeline_mode = #tpu.pipeline_mode<synchronous>, transform_indices = @transform_2, window_bounds = array<i64: 1, 256>}, {pipeline_mode = #tpu.pipeline_mode<synchronous>, transform_indices = @transform_3, window_bounds = array<i64: 256, 256>}, {pipeline_mode = #tpu.pipeline_mode<synchronous>, transform_indices = @transform_4, window_bounds = array<i64: 1, 256>}, {pipeline_mode = #tpu.pipeline_mode<synchronous>, transform_indices = @transform_5, window_bounds = array<i64: 256, 128>}, {pipeline_mode = #tpu.pipeline_mode<synchronous>, transform_indices = @transform_6, window_bounds = array<i64: 1, 128>}, {transform_indices = @transform_7, window_bounds = array<i64: 32, 128>}]} {
    %c0 = arith.constant 0 : index
    %c0_0 = arith.constant 0 : index
    %0 = vector.load %arg1[%c0, %c0_0] : memref<32x19xf32, #tpu.memory_space<vmem>>, vector<32x19xf32>
    %1 = arith.truncf %0 : vector<32x19xf32> to vector<32x19xbf16>
    %c0_1 = arith.constant 0 : index
    %c0_2 = arith.constant 0 : index
    %2 = vector.load %arg2[%c0_1, %c0_2] : memref<19x256xbf16, #tpu.memory_space<vmem>>, vector<19x256xbf16>
    %cst = arith.constant dense<0.000000e+00> : vector<32x256xf32>
    %3 = tpu.matmul %1, %2, %cst {dimension_numbers = #tpu.dot_dimension_numbers<[1], [0], [0], [1], [0, 0, 1, 1], [], []>} : vector<32x19xbf16>, vector<19x256xbf16>, vector<32x256xf32> -> vector<32x256xf32>
    %c0_3 = arith.constant 0 : index
    %c0_4 = arith.constant 0 : index
    %4 = vector.load %arg3[%c0_3, %c0_4] : memref<1x256xf32, #tpu.memory_space<vmem>>, vector<1x256xf32>
    %5 = vector.broadcast %4 : vector<1x256xf32> to vector<32x256xf32>
    %6 = arith.addf %3, %5 : vector<32x256xf32>
    %cst_5 = arith.constant 0.000000e+00 : f32
    %7 = vector.broadcast %cst_5 : f32 to vector<32x256xf32>
    %8 = arith.maximumf %6, %7 : vector<32x256xf32>
    %9 = arith.truncf %8 : vector<32x256xf32> to vector<32x256xbf16>
    %c0_6 = arith.constant 0 : index
    %c0_7 = arith.constant 0 : index
    %10 = vector.load %arg4[%c0_6, %c0_7] : memref<256x256xbf16, #tpu.memory_space<vmem>>, vector<256x256xbf16>
    %cst_8 = arith.constant dense<0.000000e+00> : vector<32x256xf32>
    %11 = tpu.matmul %9, %10, %cst_8 {dimension_numbers = #tpu.dot_dimension_numbers<[1], [0], [0], [1], [0, 0, 1, 1], [], []>} : vector<32x256xbf16>, vector<256x256xbf16>, vector<32x256xf32> -> vector<32x256xf32>
    %c0_9 = arith.constant 0 : index
    %c0_10 = arith.constant 0 : index
    %12 = vector.load %arg5[%c0_9, %c0_10] : memref<1x256xf32, #tpu.memory_space<vmem>>, vector<1x256xf32>
    %13 = vector.broadcast %12 : vector<1x256xf32> to vector<32x256xf32>
    %14 = arith.addf %11, %13 : vector<32x256xf32>
    %cst_11 = arith.constant 0.000000e+00 : f32
    %15 = vector.broadcast %cst_11 : f32 to vector<32x256xf32>
    %16 = arith.maximumf %14, %15 : vector<32x256xf32>
    %17 = arith.truncf %16 : vector<32x256xf32> to vector<32x256xbf16>
    %c0_12 = arith.constant 0 : index
    %c0_13 = arith.constant 0 : index
    %18 = vector.load %arg6[%c0_12, %c0_13] : memref<256x128xbf16, #tpu.memory_space<vmem>>, vector<256x128xbf16>
    %cst_14 = arith.constant dense<0.000000e+00> : vector<32x128xf32>
    %19 = tpu.matmul %17, %18, %cst_14 {dimension_numbers = #tpu.dot_dimension_numbers<[1], [0], [0], [1], [0, 0, 1, 1], [], []>} : vector<32x256xbf16>, vector<256x128xbf16>, vector<32x128xf32> -> vector<32x128xf32>
    %c0_15 = arith.constant 0 : index
    %c0_16 = arith.constant 0 : index
    %20 = vector.load %arg7[%c0_15, %c0_16] : memref<1x128xf32, #tpu.memory_space<vmem>>, vector<1x128xf32>
    %21 = vector.broadcast %20 : vector<1x128xf32> to vector<32x128xf32>
    %22 = arith.addf %19, %21 : vector<32x128xf32>
    %23 = math.tanh %22 : vector<32x128xf32>
    %cst_17 = arith.constant 1.000000e+00 : f32
    %24 = vector.broadcast %cst_17 : f32 to vector<32x128xf32>
    %25 = arith.addf %23, %24 : vector<32x128xf32>
    %cst_18 = arith.constant 3.500000e+00 : f32
    %26 = vector.broadcast %cst_18 : f32 to vector<32x128xf32>
    %27 = arith.mulf %26, %25 : vector<32x128xf32>
    %cst_19 = arith.constant -5.000000e+00 : f32
    %28 = vector.broadcast %cst_19 : f32 to vector<32x128xf32>
    %29 = arith.addf %28, %27 : vector<32x128xf32>
    %30 = math.exp %29 : vector<32x128xf32>
    %31 = tpu.iota {dimensions = array<i32: 1>} : vector<32x128xi32>
    %c7_i32 = arith.constant 7 : i32
    %32 = vector.broadcast %c7_i32 : i32 to vector<32x128xi32>
    %33 = arith.cmpi slt, %31, %32 : vector<32x128xi32>
    %34 = arith.select %33, %22, %30 : vector<32x128xi1>, vector<32x128xf32>
    %35 = arith.truncf %34 : vector<32x128xf32> to vector<32x128xbf16>
    %c0_20 = arith.constant 0 : index
    %c0_21 = arith.constant 0 : index
    %36 = vector.load %arg8[%c0_20, %c0_21] : memref<32x128xbf16, #tpu.memory_space<vmem>>, vector<32x128xbf16>
    tpu.vector_store %arg8[%c0_20, %c0_21], %35 {strides = array<i32>} : memref<32x128xbf16, #tpu.memory_space<vmem>>, vector<32x128xbf16>,
    return
  }
  func.func @transform_0(%arg0: i32) -> (i32, i32) {
    %c0_i32 = arith.constant 0 : i32
    %c0_i32_0 = arith.constant 0 : i32
    return %arg0, %c0_i32 : i32, i32
  }
  func.func @transform_1(%arg0: i32) -> (i32, i32) {
    %c0_i32 = arith.constant 0 : i32
    %c0_i32_0 = arith.constant 0 : i32
    %c0_i32_1 = arith.constant 0 : i32
    return %c0_i32, %c0_i32_0 : i32, i32
  }
  func.func @transform_2(%arg0: i32) -> (i32, i32) {
    %c0_i32 = arith.constant 0 : i32
    %c0_i32_0 = arith.constant 0 : i32
    %c0_i32_1 = arith.constant 0 : i32
    return %c0_i32, %c0_i32_0 : i32, i32
  }
  func.func @transform_3(%arg0: i32) -> (i32, i32) {
    %c0_i32 = arith.constant 0 : i32
    %c0_i32_0 = arith.constant 0 : i32
    %c0_i32_1 = arith.constant 0 : i32
    return %c0_i32, %c0_i32_0 : i32, i32
  }
  func.func @transform_4(%arg0: i32) -> (i32, i32) {
    %c0_i32 = arith.constant 0 : i32
    %c0_i32_0 = arith.constant 0 : i32
    %c0_i32_1 = arith.constant 0 : i32
    return %c0_i32, %c0_i32_0 : i32, i32
  }
  func.func @transform_5(%arg0: i32) -> (i32, i32) {
    %c0_i32 = arith.constant 0 : i32
    %c0_i32_0 = arith.constant 0 : i32
    %c0_i32_1 = arith.constant 0 : i32
    return %c0_i32, %c0_i32_0 : i32, i32
  }
  func.func @transform_6(%arg0: i32) -> (i32, i32) {
    %c0_i32 = arith.constant 0 : i32
    %c0_i32_0 = arith.constant 0 : i32
    %c0_i32_1 = arith.constant 0 : i32
    return %c0_i32, %c0_i32_0 : i32, i32
  }
  func.func @transform_7(%arg0: i32) -> (i32, i32) {
    %c0_i32 = arith.constant 0 : i32
    %c0_i32_0 = arith.constant 0 : i32
    return %arg0, %c0_i32 : i32, i32
  }
}

</mosaic_0001>

<bundles_post_ra>
// kernel: tpu_custom_call.1
= control target key start
LH: loop header
LB: loop body
LE: loop exit
PB: predicated region body
PF: predicated region fallthrough
CT: control target
= control target key end

     0   :  { %12 = vsyncpa [#allocation3], 0  ;;  %s1692_s0 = inlined_call_operand.vmem [shape: f32[37,19], index: 0, kind: input, shape index: {}]   ;;  %s1693_s1 = inlined_call_operand.vmem [shape: bf16[19,256], index: 1, kind: input, shape index: {}]   ;;  %s1694_s2 = inlined_call_operand.vmem [shape: f32[1,256], index: 2, kind: input, shape index: {}]   ;;  %s1695_s3 = inlined_call_operand.hbm [shape: bf16[256,256], index: 3, kind: input, shape index: {}]   ;;  %s1696_s4 = inlined_call_operand.vmem [shape: f32[1,256], index: 4, kind: input, shape index: {}]   ;;  %s1697_s5 = inlined_call_operand.hbm [shape: bf16[256,128], index: 5, kind: input, shape index: {}]   ;;  %s1698_s6 = inlined_call_operand.vmem [shape: f32[1,128], index: 6, kind: input, shape index: {}]   ;;  %s1699_s7 = inlined_call_operand.hbm [shape: bf16[37,128], index: 7, kind: output, shape index: {}]  }
   0x1   :  { %13 = vsyncpa [#allocation6], 0 }
   0x2   :  { %14 = vsyncpa [#allocation4], 0 }
   0x3   :  { %16 = vsyncpa [#allocation4 + $0x1], 0  ;;  %s1509_s24 = smov 0   ;;  %s1511_s25 = smov 0  }
   0x4   :  { %s1513_s26 = smov 0   ;;  %s1515_s27 = smov 0  }
   0x5 LB: > { %s1530_s28 = sadd.s32 4294967295, %s1456_s27   ;;  %s1061_s29 = sadd.s32 4294967294, %s1456_s27   ;;  %s1456_s27 = sphi %s1515_s27, %s1713_s27   ;;  %s1452_s26 = sphi %s1513_s26, %s1712_s26   ;;  %s1448_s25 = sphi %s1511_s25, %s1711_s25   ;;  %s1444_s24 = sphi %s1509_s24, %s1710_s24  }
   0x6   : > { %s1534_s30 = sadd.s32 1, %s1456_s27   ;;  %s181_s8 = sadd.s32 1, %s1452_s26 }
   0x7   : > { %s178_s9 = ssub.s32 %s1456_s27, %s1534_s30  ;;  %p191_p0 = scmp.ne.s32.totalorder %s1452_s26, %s1448_s25 }
   0x8   : > { %p179_p1 = scmp.eq.s32.totalorder %s178_s9, 0  ;;  %p192_p2 = scmp.eq.s32.totalorder %s1530_s28, 1 }
   0x9   : > { %p197_p3 = scmp.ne.s32.totalorder %s1448_s25, %s1444_s24  ;;  %p198_p4 = scmp.eq.s32.totalorder %s1061_s29, 1 }
   0xa   : > { %s1545_s10 = scalar_select %p179_p1, %s1452_s26, %s181_s8  }
   0xb   : > { %p1547_p5 = por %p192_p2, %p191_p0  ;;  %p1551_p6 = por %p198_p4, %p197_p3 }
   0xc   : > { %p1062_p7 = scmp.ge.s32.totalorder %s1456_s27, 1  ;;  %p205_p8 = scmp.lt.s32.totalorder %s1456_s27, 3 }
   0xd   : > { %s1702_s12 = scalar_select %p1551_p6, 1, 0 }
   0xe   : > { %p1700_p9 = scmp.eq.s32.totalorder %s1530_s28, 0  ;;  %p1558_p10 = pnand %p1062_p7, %p205_p8 }
   0xf   : > { %s1458_s14 = smov [#allocation2]   ;;  %s1459_s17 = smov [#allocation5]  }
  0x10   : > { %s223_s15 = sshll.u32 %s1458_s14, 4  ;;  %p1193_p11 = pneg %p1558_p10  ;;  %s224_s15 = int_to_ptr.vmem [resolvable:$true] %s223_s15 }
  0x11   : > { %s239_s18 = sshll.u32 %s1459_s17, 4  ;;  %s1347_s19 = scalar_lea.vmem %s224_s15, 4096  ;;  %s240_s18 = int_to_ptr.vmem [resolvable:$true] %s239_s18 }
  0x12   : > { %p1566_p12 = pnand %p1700_p9, %p1193_p11  ;;  %p1348_p0 = scmp.ne.s32.totalorder %s224_s15, %s1347_s19 }
  0x13   : > { %p1355_p3 = scmp.lt.s32.totalorder %s224_s15, %s224_s15  ;;  %p1356_p4 = scmp.lt.s32.totalorder %s1347_s19, %s1347_s19 }
  0x14   : > { %p1338_p13 = pneg %p1566_p12 }
  0x15   : > { %p1357_p7 = por %p1356_p4, %p1355_p3 }
  0x16   : > { %p1350_p1 = pnand %p1348_p0, %p1338_p13 }
  0x18   : > { %p1351_p2 = pneg %p1350_p1 }
  0x1a   : > { %p1358_p8 = pnand %p1357_p7, %p1351_p2 }
  0x1c   : > { %1361 = shalt.err (!%p1358_p8)
}
  0x1d   : > { %s1460_s20 = smov 128   ;;  %s1461_s21 = smov 8  }
  0x1e   : > { %1196 = dma.hbm_to_vmem [thread:$0]  (!%p1566_p12), %s1695_s3, 4096, %s224_s15, [#allocation3], %s1460_s20, %s1460_s20, %s1461_s21  }
  0x1f   : > { %s1373_s29 = scalar_lea.vmem %s240_s18, 2048  ;;  %p1381_p9 = scmp.lt.s32.totalorder %s240_s18, %s240_s18 }
  0x20   : > { %p1374_p11 = scmp.ne.s32.totalorder %s240_s18, %s1373_s29  ;;  %p1382_p6 = scmp.lt.s32.totalorder %s1373_s29, %s1373_s29 }
  0x22   : > { %p1376_p0 = pnand %p1374_p11, %p1338_p13  ;;  %p1383_p3 = por %p1382_p6, %p1381_p9 }
  0x24   : > { %p1377_p1 = pneg %p1376_p0 }
  0x26   : > { %p1384_p2 = pnand %p1383_p3, %p1377_p1 }
  0x28   : > { %1387 = shalt.err (!%p1384_p2)
}
  0x29   : > { %s1462_s8 = smov 64   ;;  %s1463_s9 = smov 4  }
  0x2a   : > { %1199 = dma.hbm_to_vmem [thread:$0]  (!%p1566_p12), %s1697_s5, 2048, %s240_s18, [#allocation6], %s1462_s8, %s1462_s8, %s1463_s9  }
  0x2b   : > { %275 = sbr.rel (%p1558_p10) target bundleno = 756 (0x2f4), region = 48  ;;  %p1705_p4 = scmp.eq.s32.totalorder (!%p1558_p10), %s1530_s28, 0 }
  0x30   : > { %1431 = dma.done.wait (%p1705_p4), [#allocation3], 4096   ;;  %p1706_p13 = pmov %p1705_p4 }
  0x31   : > { %p1707_p6 = pmov %p1705_p4 }
  0x32   : > { %1433 = vsyncadd (%p1706_p13), [#allocation3], 4294963200 }
  0x33   : > { %1435 = dma.done.wait (%p1707_p6), [#allocation6], 2048   ;;  %p1708_p9 = pmov %p1705_p4 }
  0x34   : > { %vm378_vm0 = vcmask 1040384   ;;  %v1464_v0 = vmov 0   ;;  %s1599_s15 = sshll.u32 %s1530_s28, 2  ;;  %vm379_vm1 = vcmask 1041408   ;;  %v1465_v1 = vmov 65535   ;;  %v1304_v49 = vld [vmem:[#allocation5 + $0x78] sm:$0xff]  }
  0x35   : > { %1437 = vsyncadd (%p1708_p9), [#allocation6], 4294965248  ;;  %420 = vmatprep.mubr.bf16.mxu0 %v1464_v0  ;;  %p320_p10 = scmp.lt.s32.totalorder %s1599_s15, 4  ;;  %v380_v2 = vsel %vm378_vm0, 4294967295, %v1465_v1  ;;  %v343_v3 = vld [vmem:[%s1693_s1 + $0x10] sm:$0x33]  ;;  %v346_v59 = vlaneseq }
  0x36   : > { %v381_v4 = vsel %vm379_vm1, %v380_v2, 0  ;;  %v1075_v5 = vcombine.high %v343_v3, %v343_v3  ;;  %v1074_v6 = vcombine.low %v343_v3, %v343_v3  ;;  %v1253_v7 = vld [vmem:[%s1693_s1 + $0x4] ss:$8 sps:$4 sm:$0xff]   ;;  %v1256_v10 = vld [vmem:[#allocation2 + $0x74] ss:$8 sps:$4 sm:$0xff]   ;;  %vm371_vm2 = vcmask 154624  }
  0x37   : > { %s321_s13 = scalar_select %p320_p10, %s1599_s15, 4  ;;  %v1255_v11 = vld [vmem:[%s1693_s1] ss:$8 sps:$4 sm:$0xff]   ;;  %v1258_v12 = vld [vmem:[#allocation2 + $0x70] ss:$8 sps:$4 sm:$0xff]   ;;  %657 = vmatprep.subr.bf16.mxu1 %v1256_v10  ;;  %v347_v60 = vshrl.u32 %v346_v59, 7 }
  0x38   : > { %v386_v8 = vand.u32 %v1075_v5, %v381_v4  ;;  %v383_v9 = vand.u32 %v1074_v6, %v381_v4  ;;  %v1259_v14 = vld [vmem:[#allocation2 + $0x64] ss:$8 sps:$4 sm:$0xff]   ;;  %658 = vmatpush1.bf16.msra.mxu1 %v1258_v12  ;;  %v1261_v16 = vld [vmem:[#allocation2 + $0x60] ss:$8 sps:$4 sm:$0xff]   ;;  %v1262_v17 = vld [vmem:[#allocation2 + $0x54] ss:$8 sps:$4 sm:$0xff]  }
  0x39   : > { %s1071_s16 = sshll.u32 %s321_s13, 3  ;;  %659 = vmatprep.subr.bf16.mxu1 %v1259_v14  ;;  %v1264_v19 = vld [vmem:[#allocation2 + $0x50] ss:$8 sps:$4 sm:$0xff]   ;;  %v1265_v20 = vld [vmem:[#allocation2 + $0x44] ss:$8 sps:$4 sm:$0xff]   ;;  %v352_v61 = vsub.s32 1, %v347_v60 }
  0x3a   : > { %s323_s29 = scalar_lea.vmem %s1692_s0, %s1071_s16  ;;  %400 = vmatprep.subr.bf16.mxu0 %v386_v8  ;;  %v1267_v23 = vld [vmem:[#allocation2 + $0x40] ss:$8 sps:$4 sm:$0xff]   ;;  %v1268_v24 = vld [vmem:[#allocation2 + $0x34] ss:$8 sps:$4 sm:$0xff]   ;;  %v1270_v26 = vld [vmem:[#allocation2 + $0x30] ss:$8 sps:$4 sm:$0xff]  }
  0x3b   : > { %v335_v13 = vld [vmem:[%s323_s29] sm:$0xff]  ;;  %401 = vmatpush1.bf16.msra.mxu0 %v383_v9  ;;  %v336_v15 = vld [vmem:[%s323_s29 + $0x8] sm:$0xff]  ;;  %v337_v21 = vld [vmem:[%s323_s29 + $0x10] sm:$0xff]  ;;  %v348_v62 = vsub.s32 0, %v347_v60  ;;  %s312_s18 = sand.u32 1, %s1448_s25  }
  0x3c   : > { %402 = vmatprep.subr.bf16.mxu0 %v1253_v7  ;;  %v339_v18 = vpack.c.bf16 %v336_v15, %v335_v13  ;;  %660 = vmatpush1.bf16.msra.mxu1 %v1261_v16  ;;  %v338_v22 = vld [vmem:[%s323_s29 + $0x18] sm:$0xff]  ;;  %v1271_v27 = vld [vmem:[#allocation2 + $0x24] ss:$8 sps:$4 sm:$0xff]   ;;  %v1273_v28 = vld [vmem:[#allocation2 + $0x20] ss:$8 sps:$4 sm:$0xff]   ;;  %s1069_s21 = sshll.u32 %s312_s18, 4 }
  0x3d   : > { %661 = vmatprep.subr.bf16.mxu1 %v1262_v17  ;;  %v340_v25 = vpack.c.bf16 %v338_v22, %v337_v21  ;;  %v1274_v29 = vld [vmem:[#allocation2 + $0x14] ss:$8 sps:$4 sm:$0xff]   ;;  %v1276_v30 = vld [vmem:[#allocation2 + $0x10] ss:$8 sps:$4 sm:$0xff]   ;;  %v1277_v31 = vld [vmem:[#allocation2 + $0x4] ss:$8 sps:$4 sm:$0xff]  }
  0x3e   : > { %v1279_v32 = vld [vmem:[#allocation2] ss:$8 sps:$4 sm:$0xff]   ;;  %v1280_v33 = vld [vmem:[#allocation2 + $0xf4] ss:$8 sps:$4 sm:$0xff]   ;;  %v1282_v34 = vld [vmem:[#allocation2 + $0xf0] ss:$8 sps:$4 sm:$0xff]  }
  0x3f   : > { %403 = vmatpush1.bf16.msra.mxu0 %v1255_v11  ;;  %v1283_v35 = vld [vmem:[#allocation2 + $0xe4] ss:$8 sps:$4 sm:$0xff]   ;;  %v1285_v36 = vld [vmem:[#allocation2 + $0xe0] ss:$8 sps:$4 sm:$0xff]   ;;  %v1286_v37 = vld [vmem:[#allocation2 + $0xd4] ss:$8 sps:$4 sm:$0xff]  }
  0x40   : > { %662 = vmatpush1.bf16.msra.mxu1 %v1264_v19  ;;  %v1288_v38 = vld [vmem:[#allocation2 + $0xd0] ss:$8 sps:$4 sm:$0xff]   ;;  %v1289_v39 = vld [vmem:[#allocation2 + $0xc4] ss:$8 sps:$4 sm:$0xff]   ;;  %v1291_v40 = vld [vmem:[#allocation2 + $0xc0] ss:$8 sps:$4 sm:$0xff]   ;;  %1156 = vmatprep.subr.bf16.mxu0 %v1304_v49 }
  0x41   : > { %663 = vmatprep.subr.bf16.mxu1 %v1265_v20  ;;  %v1292_v41 = vld [vmem:[#allocation2 + $0xb4] ss:$8 sps:$4 sm:$0xff]   ;;  %v1294_v42 = vld [vmem:[#allocation2 + $0xb0] ss:$8 sps:$4 sm:$0xff]   ;;  %v1295_v43 = vld [vmem:[#allocation2 + $0xa4] ss:$8 sps:$4 sm:$0xff]  }
  0x42   : > { %1076 = vmatmul.mubr.msk.bf16.vlgmr.msra.gmra.mxu0 %vm371_vm2, %v339_v18  ;;  %v1297_v44 = vld [vmem:[#allocation2 + $0xa0] ss:$8 sps:$4 sm:$0xff]   ;;  %v1298_v45 = vld [vmem:[#allocation2 + $0x94] ss:$8 sps:$4 sm:$0xff]   ;;  %v1300_v46 = vld [vmem:[#allocation2 + $0x90] ss:$8 sps:$4 sm:$0xff]  }
  0x43   : > { %430 = vmatprep.mubr.bf16.mxu0 %v1464_v0  ;;  %v1301_v47 = vld [vmem:[#allocation2 + $0x84] ss:$8 sps:$4 sm:$0xff]   ;;  %v1303_v48 = vld [vmem:[#allocation2 + $0x80] ss:$8 sps:$4 sm:$0xff]   ;;  %v1305_v50 = vld [vmem:[#allocation5 + $0x38] sm:$0xff]   ;;  %s314_s22 = scalar_lea.vmem [#allocation7], %s1069_s21 }
  0x44   : > { %664 = vmatpush1.bf16.msra.mxu1 %v1267_v23  ;;  %v1306_v51 = vld [vmem:[#allocation5 + $0x70] sm:$0xff]   ;;  %1157 = vmatpush3.bf16.msra.mxu0 %v1305_v50  ;;  %v1308_v53 = vld [vmem:[#allocation5 + $0x68] sm:$0xff]   ;;  %v1310_v55 = vld [vmem:[#allocation5 + $0x60] sm:$0xff]   ;;  %s1633_s23 = scalar_lea.sflag [#allocation4], %s312_s18  ;;  %s966_s29 = ssub.s32 (%p1547_p5), 5, %s1599_s15 }
  0x45   : > { %665 = vmatprep.subr.bf16.mxu1 %v1268_v24  ;;  %v1307_v52 = vld [vmem:[#allocation5 + $0x30] sm:$0xff]   ;;  %1158 = vmatprep.subr.bf16.mxu0 %v1306_v51  ;;  %v1309_v54 = vld [vmem:[#allocation5 + $0x28] sm:$0xff]   ;;  %v1311_v56 = vld [vmem:[#allocation5 + $0x20] sm:$0xff]   ;;  %p967_p12 = scmp.lt.s32.totalorder (%p1547_p5), %s966_s29, 4 }
  0x46   : > { %v1312_v57 = vld [vmem:[#allocation5 + $0x58] sm:$0xff]   ;;  %v344_v63 = vld [vmem:[%s1694_s2] sm:$0x3] }
  0x47   : > { %v1313_v58 = vld [vmem:[#allocation5 + $0x18] sm:$0xff]   ;;  %v353_v1 = vrot.slane %v344_v63, %v352_v61  ;;  %v349_v2 = vrot.slane %v344_v63, %v348_v62 }
  0x48   : > { %666 = vmatpush1.bf16.msra.mxu1 %v1270_v26  ;;  %1159 = vmatpush3.bf16.msra.mxu0 %v1307_v52 }
  0x49   : > { %667 = vmatprep.subr.bf16.mxu1 %v1271_v27  ;;  %1160 = vmatprep.subr.bf16.mxu0 %v1308_v53 }
  0x4a   : > { %1077 = vmatmul.mubr.msk.bf16.gmra.mxu0 %vm371_vm2, %v340_v25 }
  0x4c   : > { %668 = vmatpush1.bf16.msra.mxu1 %v1273_v28  ;;  %1161 = vmatpush3.bf16.msra.mxu0 %v1309_v54 }
  0x4d   : > { %669 = vmatprep.subr.bf16.mxu1 %v1274_v29  ;;  %1162 = vmatprep.subr.bf16.mxu0 %v1310_v55 }
  0x50   : > { %670 = vmatpush1.bf16.msra.mxu1 %v1276_v30  ;;  %1163 = vmatpush3.bf16.msra.mxu0 %v1311_v56  ;;  %v1314_v30 = vld [vmem:[#allocation5 + $0x50] sm:$0xff]  }
  0x51   : > { %671 = vmatprep.subr.bf16.mxu1 %v1277_v31  ;;  %1164 = vmatprep.subr.bf16.mxu0 %v1312_v57  ;;  %v1315_v31 = vld [vmem:[#allocation5 + $0x10] sm:$0xff]  }
  0x54   : > { %672 = vmatpush1.bf16.msra.mxu1 %v1279_v32  ;;  %1165 = vmatpush3.bf16.msra.mxu0 %v1313_v58  ;;  %v1316_v32 = vld [vmem:[#allocation5 + $0x48] sm:$0xff]  }
  0x55   : > { %673 = vmatprep.subr.bf16.mxu1 %v1280_v33  ;;  %1166 = vmatprep.subr.bf16.mxu0 %v1314_v30  ;;  %v1317_v33 = vld [vmem:[#allocation5 + $0x8] sm:$0xff]  }
  0x58   : > { %674 = vmatpush2.bf16.msra.mxu1 %v1282_v34  ;;  %1167 = vmatpush3.bf16.msra.mxu0 %v1315_v31  ;;  %v1318_v34 = vld [vmem:[#allocation5 + $0x40] sm:$0xff]  }
  0x59   : > { %675 = vmatprep.subr.bf16.mxu1 %v1283_v35  ;;  %1168 = vmatprep.subr.bf16.mxu0 %v1316_v32  ;;  %v1319_v35 = vld [vmem:[#allocation5] sm:$0xff]  }
  0x5c   : > { %676 = vmatpush2.bf16.msra.mxu1 %v1285_v36  ;;  %1169 = vmatpush3.bf16.msra.mxu0 %v1317_v33  ;;  %v485_v36 = vld [vmem:[%s1696_s4] sm:$0x3] }
  0x5d   : > { %677 = vmatprep.subr.bf16.mxu1 %v1286_v37  ;;  %1170 = vmatprep.subr.bf16.mxu0 %v1318_v34 }
  0x60   : > { %678 = vmatpush2.bf16.msra.mxu1 %v1288_v38  ;;  %1171 = vmatpush3.bf16.msra.mxu0 %v1319_v35  ;;  %v494_v38 = vrot.slane %v485_v36, %v352_v61 }
  0x61   : > { %679 = vmatprep.subr.bf16.mxu1 %v1289_v39  ;;  %v490_v39 = vrot.slane %v485_v36, %v348_v62 }
  0x64   : > { %680 = vmatpush2.bf16.msra.mxu1 %v1291_v40 }
  0x65   : > { %681 = vmatprep.subr.bf16.mxu1 %v1292_v41 }
  0x68   : > { %682 = vmatpush2.bf16.msra.mxu1 %v1294_v42 }
  0x69   : > { %683 = vmatprep.subr.bf16.mxu1 %v1295_v43 }
  0x6c   : > { %684 = vmatpush2.bf16.msra.mxu1 %v1297_v44 }
  0x6d   : > { %685 = vmatprep.subr.bf16.mxu1 %v1298_v45 }
  0x70   : > { %686 = vmatpush2.bf16.msra.mxu1 %v1300_v46 }
  0x71   : > { %687 = vmatprep.subr.bf16.mxu1 %v1301_v47 }
  0x74   : > { %688 = vmatpush2.bf16.msra.mxu1 %v1303_v48 }
 0x102   : > { %v422_v0 = vpop.f32.mrf.mxu0 }
 0x103   : > { %v423_v7 = vadd.f32 %v422_v0, %v349_v2 }
 0x104   : > { %v424_v3 = vpop.f32.mrf.mxu0 }
 0x105   : > { %v425_v5 = vadd.f32 %v424_v3, %v353_v1  ;;  %v441_v14 = vmax.f32 %v423_v7, 0.0 }
 0x106   : > { %v426_v4 = vpop.f32.mrf.mxu0 }
 0x107   : > { %v427_v6 = vadd.f32 %v426_v4, %v349_v2  ;;  %v442_v12 = vmax.f32 %v425_v5, 0.0  ;;  %v1110_v5 = vld [vmem:[%s1698_s6] ss:$0 sm:$0xff] }
 0x108   : > { %v428_v8 = vpop.f32.mrf.mxu0 }
 0x109   : > { %v429_v9 = vadd.f32 %v428_v8, %v353_v1  ;;  %v443_v10 = vmax.f32 %v427_v6, 0.0 }
 0x10a   : > { %v432_v11 = vpop.f32.mrf.mxu0 }
 0x10b   : > { %v444_v13 = vmax.f32 %v429_v9, 0.0  ;;  %v449_v17 = vpack.c.bf16 %v443_v10, %v441_v14  ;;  %v433_v21 = vadd.f32 %v432_v11, %v349_v2 }
 0x10c   : > { %v434_v15 = vpop.f32.mrf.mxu0 }
 0x10d   : > { %v450_v16 = vpack.c.bf16 %v444_v13, %v442_v12  ;;  %v435_v19 = vadd.f32 %v434_v15, %v353_v1  ;;  %v445_v27 = vmax.f32 %v433_v21, 0.0 }
 0x10e   : > { %v436_v18 = vpop.f32.mrf.mxu0 }
 0x10f   : > { %v437_v20 = vadd.f32 %v436_v18, %v349_v2  ;;  %689 = vmatprep.mubr.bf16.mxu1 %v450_v16  ;;  %v446_v25 = vmax.f32 %v435_v19, 0.0 }
 0x110   : > { %v438_v22 = vpop.f32.mrf.mxu0  ;;  %690 = vmatmul.mubr.bf16.vlgmr.msra.gmra.mxu1 %v449_v17 }
 0x111   : > { %v439_v23 = vadd.f32 %v438_v22, %v353_v1  ;;  %v447_v24 = vmax.f32 %v437_v20, 0.0 }
 0x113   : > { %v448_v26 = vmax.f32 %v439_v23, 0.0  ;;  %v451_v29 = vpack.c.bf16 %v447_v24, %v445_v27 }
 0x115   : > { %v452_v28 = vpack.c.bf16 %v448_v26, %v446_v25 }
 0x117   : > { %699 = vmatprep.mubr.bf16.mxu1 %v452_v28 }
 0x118   : > { %700 = vmatmul.mubr.bf16.gmra.mxu1 %v451_v29 }
 0x1d0   : > { %v691_v37 = vpop.f32.mrf.mxu1 }
 0x1d1   : > { %v692_v44 = vadd.f32 %v691_v37, %v490_v39 }
 0x1d2   : > { %v693_v40 = vpop.f32.mrf.mxu1 }
 0x1d3   : > { %v694_v42 = vadd.f32 %v693_v40, %v494_v38  ;;  %v710_v51 = vmax.f32 %v692_v44, 0.0 }
 0x1d4   : > { %v695_v41 = vpop.f32.mrf.mxu1 }
 0x1d5   : > { %v696_v43 = vadd.f32 %v695_v41, %v490_v39  ;;  %v711_v49 = vmax.f32 %v694_v42, 0.0  ;;  %v931_v41 = vand.u32 127, %v346_v59 }
 0x1d6   : > { %v697_v45 = vpop.f32.mrf.mxu1 }
 0x1d7   : > { %v698_v46 = vadd.f32 %v697_v45, %v494_v38  ;;  %v712_v47 = vmax.f32 %v696_v43, 0.0  ;;  %vm932_vm3 = vcmp.lt.s32.totalorder %v931_v41, 7 }
 0x1d8   : > { %v701_v48 = vpop.f32.mrf.mxu1 }
 0x1d9   : > { %v713_v50 = vmax.f32 %v698_v46, 0.0  ;;  %v718_v54 = vpack.c.bf16 %v712_v47, %v710_v51  ;;  %v702_v58 = vadd.f32 %v701_v48, %v490_v39 }
 0x1da   : > { %v703_v52 = vpop.f32.mrf.mxu1 }
 0x1db   : > { %v719_v53 = vpack.c.bf16 %v713_v50, %v711_v49  ;;  %v704_v56 = vadd.f32 %v703_v52, %v494_v38  ;;  %v714_v1 = vmax.f32 %v702_v58, 0.0 }
 0x1dc   : > { %v705_v55 = vpop.f32.mrf.mxu1 }
 0x1dd   : > { %v706_v57 = vadd.f32 %v705_v55, %v490_v39  ;;  %889 = vmatprep.mubr.bf16.mxu0 %v719_v53  ;;  %v715_v63 = vmax.f32 %v704_v56, 0.0 }
 0x1de   : > { %v707_v60 = vpop.f32.mrf.mxu1  ;;  %890 = vmatmul.mubr.bf16.vlgmr.msra.gmra.mxu0 %v718_v54 }
 0x1df   : > { %v708_v61 = vadd.f32 %v707_v60, %v494_v38  ;;  %v716_v62 = vmax.f32 %v706_v57, 0.0 }
 0x1e1   : > { %v717_v0 = vmax.f32 %v708_v61, 0.0  ;;  %v720_v3 = vpack.c.bf16 %v716_v62, %v714_v1 }
 0x1e3   : > { %v721_v2 = vpack.c.bf16 %v717_v0, %v715_v63 }
 0x1e5   : > { %897 = vmatprep.mubr.bf16.mxu0 %v721_v2 }
 0x1e6   : > { %898 = vmatmul.mubr.bf16.gmra.mxu0 %v720_v3 }
 0x29e   : > { %v1172_v4 = vpop.f32.mrf.mxu0 }
 0x2a0   : > { %v1173_v6 = vpop.f32.mrf.mxu0 }
 0x2a1   : > { %v1174_v7 = vadd.f32 %v1173_v6, %v1172_v4 }
 0x2a2   : > { %v1175_v8 = vpop.f32.mrf.mxu0 }
 0x2a3   : > { %v892_v9 = vadd.f32 %v1174_v7, %v1110_v5 }
 0x2a4   : > { %v1176_v10 = vpop.f32.mrf.mxu0 }
 0x2a5   : > { %1320 = vtanh.f32 %v892_v9  ;;  %v1177_v11 = vadd.f32 %v1176_v10, %v1175_v8 }
 0x2a6   : > { %v1178_v12 = vpop.f32.mrf.mxu0 }
 0x2a7   : > { %v895_v13 = vadd.f32 %v1177_v11, %v1110_v5 }
 0x2a8   : > { %v1179_v14 = vpop.f32.mrf.mxu0 }
 0x2a9   : > { %1322 = vtanh.f32 %v895_v13  ;;  %v1180_v15 = vadd.f32 %v1179_v14, %v1178_v12 }
 0x2aa   : > { %v1181_v16 = vpop.f32.mrf.mxu0 }
 0x2ab   : > { %v900_v17 = vadd.f32 %v1180_v15, %v1110_v5 }
 0x2ac   : > { %v1182_v18 = vpop.f32.mrf.mxu0 }
 0x2ad   : > { %1324 = vtanh.f32 %v900_v17  ;;  %v1183_v19 = vadd.f32 %v1182_v18, %v1181_v16 }
 0x2af   : > { %v903_v20 = vadd.f32 %v1183_v19, %v1110_v5 }
 0x2b1   : > { %1326 = vtanh.f32 %v903_v20 }
 0x2b2   : > { %v1321_v21 = vpop.eup %1320 }
 0x2b3   : > { %v910_v22 = vadd.f32 1.0, %v1321_v21 }
 0x2b5   : > { %v914_v23 = vmul.f32 3.5, %v910_v22 }
 0x2b6   : > { %v1323_v24 = vpop.eup %1322 }
 0x2b7   : > { %v918_v25 = vadd.f32 -5.0, %v914_v23  ;;  %v911_v26 = vadd.f32 1.0, %v1323_v24 }
 0x2b9   : > { %v922_v27 = vmul.f32 1.442695, %v918_v25  ;;  %v915_v28 = vmul.f32 3.5, %v911_v26 }
 0x2ba   : > { %v1325_v29 = vpop.eup %1324 }
 0x2bb   : > { %v919_v30 = vadd.f32 -5.0, %v915_v28  ;;  %v912_v31 = vadd.f32 1.0, %v1325_v29  ;;  %1328 = vpow2.f32 %v922_v27 }
 0x2bd   : > { %v924_v32 = vmul.f32 1.442695, %v919_v30  ;;  %v916_v33 = vmul.f32 3.5, %v912_v31 }
 0x2be   : > { %v1327_v34 = vpop.eup %1326 }
 0x2bf   : > { %1330 = vpow2.f32 %v924_v32  ;;  %v920_v35 = vadd.f32 -5.0, %v916_v33  ;;  %v913_v36 = vadd.f32 1.0, %v1327_v34 }
 0x2c1   : > { %v926_v37 = vmul.f32 1.442695, %v920_v35  ;;  %v917_v38 = vmul.f32 3.5, %v913_v36 }
 0x2c3   : > { %v921_v39 = vadd.f32 -5.0, %v917_v38  ;;  %1332 = vpow2.f32 %v926_v37 }
 0x2c5   : > { %v928_v40 = vmul.f32 1.442695, %v921_v39 }
 0x2c7   : > { %1334 = vpow2.f32 %v928_v40 }
 0x2c8   : > { %v1329_v42 = vpop.eup %1328 }
 0x2c9   : > { %v933_v44 = vsel %vm932_vm3, %v892_v9, %v1329_v42 }
 0x2cc   : > { %v1331_v43 = vpop.eup %1330 }
 0x2cd   : > { %v934_v45 = vsel %vm932_vm3, %v895_v13, %v1331_v43 }
 0x2ce   : > { %v1148_v46 = vpack.c.bf16 %v934_v45, %v933_v44 }
 0x2d0   : > { %1149 = vst [vmem:[%s314_s22] sm:$0xff] %v1148_v46   ;;  %v1333_v47 = vpop.eup %1332 }
 0x2d1   : > { %v935_v49 = vsel %vm932_vm3, %v900_v17, %v1333_v47 }
 0x2d4   : > { %v1335_v48 = vpop.eup %1334  ;;  %964 = sbr.rel (!%p1547_p5) target bundleno = 756 (0x2f4), region = 60 }
 0x2d5   : > { %v936_v50 = vsel %vm932_vm3, %v903_v20, %v1335_v48 }
 0x2d6   : > { %v1153_v51 = vpack.c.bf16 %v936_v50, %v935_v49 }
 0x2d8   : > { %1155 = vst [vmem:[%s314_s22 + $0x8] sm:$0xff] %v1153_v51  }
 0x2d9   : > { %s1715_s29 = smov (!%p967_p12, %s966_s29), 4 }
 0x2da   : > { %s1638_s8 = sshll.u32 %s1715_s29, 6 }
 0x2db   : > { %s971_s9 = ssub.s32 256, %s1638_s8 }
 0x2dc   : > { %972 = vsyncadd %s1633_s23, %s971_s9  ;;  %p1134_p7 = scmp.ne.s32.totalorder %s1638_s8, 0  ;;  %s1144_s14 = sshll.u32 %s1530_s28, 8 }
 0x2dd   : > { %s1647_s11 = scalar_lea.hbm %s1699_s7, %s1144_s14  ;;  %s977_s16 = sshll.u32 %s314_s22, 4  ;;  %s1649_s16 = int_to_ptr.vmem [resolvable:$true] %s977_s16 }
 0x2de   : > { %s1388_s15 = scalar_lea.vmem %s1649_s16, %s1638_s8  ;;  %s1466_s18 = smov [#allocation7]  }
 0x2df   : > { %p1389_p5 = scmp.ne.s32.totalorder %s1649_s16, %s1388_s15  ;;  %s1392_s19 = sshll.u32 %s1466_s18, 4  ;;  %s1393_s19 = int_to_ptr.vmem [resolvable:$false] %s1392_s19 }
 0x2e0   : > { %s1394_s28 = scalar_lea.vmem %s1393_s19, 512  ;;  %p1395_p0 = scmp.lt.s32.totalorder %s1649_s16, %s1393_s19 }
 0x2e1   : > { %p1390_p8 = pnand %p1389_p5, %p1134_p7  ;;  %p1396_p1 = scmp.lt.s32.totalorder %s1394_s28, %s1388_s15 }
 0x2e3   : > { %p1391_p11 = pneg %p1390_p8  ;;  %p1397_p3 = por %p1396_p1, %p1395_p0 }
 0x2e5   : > { %p1398_p2 = pnand %p1397_p3, %p1391_p11 }
 0x2e7   : > { %1401 = shalt.err (!%p1398_p2)
}
 0x2e8   : > { %s1402_s20 = scalar_lea.hbm %s1647_s11, %s1638_s8  ;;  %s1406_s29 = scalar_lea.hbm %s1699_s7, 320 }
 0x2e9   : > { %p1403_p4 = scmp.ne.s32.totalorder %s1647_s11, %s1402_s20  ;;  %p1407_p9 = scmp.lt.s32.totalorder %s1647_s11, %s1699_s7 }
 0x2ea   : > { %p1408_p10 = scmp.lt.s32.totalorder %s1406_s29, %s1402_s20 }
 0x2eb   : > { %p1404_p13 = pnand %p1403_p4, %p1134_p7 }
 0x2ec   : > { %p1409_p12 = por %p1408_p10, %p1407_p9 }
 0x2ed   : > { %p1405_p6 = pneg %p1404_p13 }
 0x2ef   : > { %p1410_p5 = pnand %p1409_p12, %p1405_p6 }
 0x2f1   : > { %1413 = shalt.err (!%p1410_p5)
}
 0x2f2   : > { %s1467_s17 = smov 64   ;;  %s1468_s13 = smov 4  }
 0x2f3   : > { %983 = dma.vmem_to_hbm [thread:$0]  (%p1134_p7), %s1649_s16, %s1638_s8, %s1647_s11, %s1633_s23, %s1467_s17, %s1467_s17, %s1468_s13  }
 0x2f4 PF: > { %p1208_p8 = scmp.ge.s32.totalorder %s1456_s27, 2  ;;  %s992_s15 = sand.u32 1, %s1444_s24  }
 0x2f5   : > { %p1709_p11 = scmp.ne.s32.totalorder %s1702_s12, 0  ;;  %s993_s18 = scalar_lea.sflag [#allocation4], %s992_s15 }
 0x2f7   : > { %p1201_p0 = pnand %p1208_p8, %p1709_p11 }
 0x2f9   : > { %p1202_p1 = pneg %p1201_p0 }
 0x2fb   : > { %1439 = dma.done.wait (%p1202_p1), %s993_s18, 256  }
 0x2fc   : > { %1441 = vsyncadd (%p1202_p1), %s993_s18, 4294967040  ;;  %p19_p3 = scmp.ge.s32.totalorder %s1534_s30, 4   ;;  %s1710_s24 = smov %s1448_s25 }
 0x2fd   : > { %s1711_s25 = smov %s1452_s26  ;;  %s1712_s26 = smov %s1545_s10 }
 0x2fe   : > { %s1713_s27 = smov %s1534_s30  ;;  %21 = sbr.rel (!%p19_p3) target bundleno = 5 (0x5), region = 92 }
 0x303   :  { %998 = vsyncpa [#allocation3], 1 }
 0x304   :  { %1000 = vsyncpa [#allocation3 + $0x1], 1 }
 0x305   :  { %1001 = vsyncpa [#allocation6], 1 }
 0x306   :  { %1002 = vsyncpa [#allocation4], 1 }
 0x307   :  { %1004 = vsyncpa [#allocation4 + $0x1], 1 }

</bundles_post_ra>
